<compile_context>
chip_gen: v5e
topology: v5e:2x2
jax: 0.10.0
libtpu: 0.0.40
codegen_flags: <defaults>
</compile_context>

<pallas_src>
import functools

import jax
import jax.numpy as jnp
from jax.experimental import pallas as pl
from jax.experimental.pallas import tpu as pltpu

_LANE = 128
_SUBLANE = 8
_NUM_CORE_SPLITS = 2  # leading "parallel" grid axis (uses both TCs on v7x)


def _xor_loss_kernel(wd_ref, out_ref, tgt_ref, w_ref, loss_ref, acc_ref, *,
                     rows, tile_rows, tiles_per_core, inv_n, inv_d, needs_mask):
    c = pl.program_id(0)  # core-split axis ("parallel")
    j = pl.program_id(1)  # streaming reduction axis ("arbitrary")

    @pl.when(j == 0)
    def _init():
        acc_ref[...] = jnp.zeros_like(acc_ref)

    # Pure-VPU accumulation into a tile-shaped f32 accumulator; the single
    # cross-lane/cross-sublane reduce is deferred to the finalize branch.
    d = out_ref[...].astype(jnp.float32) - tgt_ref[...].astype(jnp.float32)
    dd = d * d
    if needs_mask:
        tile_idx = c * tiles_per_core + j
        row_ids = tile_idx * tile_rows + jax.lax.broadcasted_iota(
            jnp.int32, dd.shape, 0)
        # select (not multiply): stale / NaN out-of-bounds rows must not leak.
        dd = jnp.where(row_ids < rows, dd, 0.0)
    acc_ref[...] += dd

    @pl.when(j == pl.num_programs(1) - 1)
    def _finalize():
        partial = jnp.sum(acc_ref[...], keepdims=True) * inv_n          # (1,1)
        wdiff = w_ref[...].astype(jnp.float32) - inv_d
        reg = jnp.sum(wdiff * wdiff, keepdims=True) * wd_ref[0, 0]      # (1,1)
        reg_sel = jnp.where(c == 0, reg, jnp.zeros_like(reg))           # reg once
        loss_ref[...] = jnp.reshape(partial + reg_sel, (1, 1, 1))


def _default_max_tile_rows():
    # Larger tiles amortize the ~0.35us per-grid-step overhead against faster
    # HBM: 8192 rows (4 MiB f32 / buffer) on v7x, 4096 rows elsewhere.
    try:
        kind = jax.devices()[0].device_kind.lower()
    except Exception:
        return 4096
    return 8192 if ("v7" in kind or "7x" in kind) else 4096


def xor_loss(output, target, w, weight_decay, *,
             max_tile_rows=None, min_pallas_elems=65536):
    """Pallas TPU version of xor.forward(output, target, w)."""
    assert output.shape == target.shape
    n, d_feat = target.shape
    h, dw = w.shape
    inv_n = 1.0 / float(n)
    inv_d = 1.0 / float(d_feat)

    total = n * d_feat
    main = (total // _LANE) * _LANE
    rows = main // _LANE

    # Small-input fallback: a single fused XLA reduction beats pallas_call
    # launch + Mosaic compile for tiny problems.
    if total < min_pallas_elems or rows < _SUBLANE:
        diff = jnp.sum((output.astype(jnp.float32)
                        - target.astype(jnp.float32)) ** 2) * inv_n
        reg = jnp.sum((w.astype(jnp.float32) - inv_d) ** 2) * weight_decay
        return diff + reg

    flat_o = output.reshape(-1)   # free layout change (contiguous row-major)
    flat_t = target.reshape(-1)

    if main != total:
        # Ragged total: reduce the <128-element tail in the wrapper instead of
        # materializing padded copies of both inputs.
        # TODO(synk): the prefix slice below still copies the main slab for
        # ragged totals; only the total % 128 == 0 path is fully copy-free.
        tail = jnp.sum((flat_o[main:].astype(jnp.float32)
                        - flat_t[main:].astype(jnp.float32)) ** 2)
        o2 = flat_o[:main].reshape(rows, _LANE)
        t2 = flat_t[:main].reshape(rows, _LANE)
    else:
        tail = jnp.float32(0.0)
        o2 = flat_o.reshape(rows, _LANE)          # no copy, no pad
        t2 = flat_t.reshape(rows, _LANE)

    picked = max_tile_rows if max_tile_rows is not None else _default_max_tile_rows()
    tile_rows = max(_SUBLANE, min(int(picked), (rows // _SUBLANE) * _SUBLANE))
    num_tiles = pl.cdiv(rows, tile_rows)
    tiles_per_core = pl.cdiv(num_tiles, _NUM_CORE_SPLITS)
    needs_mask = _NUM_CORE_SPLITS * tiles_per_core * tile_rows > rows

    wd = jnp.asarray(weight_decay, dtype=jnp.float32).reshape(1, 1)

    def slab_map(c, j):
        t = c * tiles_per_core + j
        # Clamp fully-out-of-range tiles (odd tile counts / core split); their
        # contribution is zeroed by the in-kernel row mask.
        return (jnp.minimum(t, num_tiles - 1), 0)

    kernel = functools.partial(
        _xor_loss_kernel, rows=rows, tile_rows=tile_rows,
        tiles_per_core=tiles_per_core, inv_n=inv_n, inv_d=inv_d,
        needs_mask=needs_mask)

    partials = pl.pallas_call(
        kernel,
        out_shape=jax.ShapeDtypeStruct((_NUM_CORE_SPLITS, 1, 1), jnp.float32),
        grid_spec=pltpu.PrefetchScalarGridSpec(
            num_scalar_prefetch=0,
            grid=(_NUM_CORE_SPLITS, tiles_per_core),
            in_specs=[
                pl.BlockSpec(memory_space=pltpu.MemorySpace.SMEM),    # weight_decay
                pl.BlockSpec((tile_rows, _LANE), slab_map),           # output slab
                pl.BlockSpec((tile_rows, _LANE), slab_map),           # target slab
                pl.BlockSpec((h, dw), lambda c, j: (0, 0)),           # w (resident)
            ],
            out_specs=pl.BlockSpec((1, 1, 1), lambda c, j: (c, 0, 0)),
            scratch_shapes=[pltpu.VMEM((tile_rows, _LANE), jnp.float32)],
        ),
        compiler_params=pltpu.CompilerParams(
            dimension_semantics=("parallel", "arbitrary"),
            vmem_limit_bytes=32 * 1024 * 1024),
    )(wd, o2, t2, w)

    return partials[0, 0, 0] + partials[1, 0, 0] + tail * inv_n


def xor_loss_ref(output, target, w, weight_decay):
    """Pure-JAX reference (mirrors the PyTorch forward exactly)."""
    diff = jnp.mean(jnp.sum((output - target) ** 2, axis=1))
    diff = diff + jnp.sum((w - 1.0 / target.shape[1]) ** 2) * weight_decay
    return diff


if __name__ == "__main__":
    key = jax.random.PRNGKey(0)
    ks = jax.random.split(key, 9)
    weight_decay = 0.01

    # 1) Shipped-size shapes (N=8, D=32, H=16) -> small-input fused-XLA fallback.
    N, D, H = 8, 32, 16
    out_s = jax.random.normal(ks[0], (N, D), dtype=jnp.float32)
    tgt_s = (jax.random.uniform(ks[1], (N, D)) > 0.5).astype(jnp.float32)
    w_s = jax.random.normal(ks[2], (H, D), dtype=jnp.float32) * 0.1
    loss_s = xor_loss(out_s, tgt_s, w_s, weight_decay)
    jax.block_until_ready(loss_s)
    ref_s = xor_loss_ref(out_s, tgt_s, w_s, weight_decay)
    assert jnp.allclose(loss_s, ref_s, rtol=1e-4, atol=1e-4), (loss_s, ref_s)

    # 2) 128-aligned case exercising the Pallas kernel (copy-free reshape path).
    N2, D2, H2 = 64, 256, 16
    out_a = jax.random.normal(ks[3], (N2, D2), dtype=jnp.float32)
    tgt_a = (jax.random.uniform(ks[4], (N2, D2)) > 0.5).astype(jnp.float32)
    w_a = jax.random.normal(ks[5], (H2, D2), dtype=jnp.float32) * 0.1
    loss_a = xor_loss(out_a, tgt_a, w_a, weight_decay, min_pallas_elems=0)
    jax.block_until_ready(loss_a)
    ref_a = xor_loss_ref(out_a, tgt_a, w_a, weight_decay)
    assert jnp.allclose(loss_a, ref_a, rtol=1e-4, atol=1e-4), (loss_a, ref_a)

    # 3) Ragged case (total % 128 != 0) exercising masked tiles + wrapper tail.
    N3, D3, H3 = 96, 99, 16
    out_r = jax.random.normal(ks[6], (N3, D3), dtype=jnp.float32)
    tgt_r = (jax.random.uniform(ks[7], (N3, D3)) > 0.5).astype(jnp.float32)
    w_r = jax.random.normal(ks[8], (H3, D3), dtype=jnp.float32) * 0.1
    loss_r = xor_loss(out_r, tgt_r, w_r, weight_decay, min_pallas_elems=0)
    jax.block_until_ready(loss_r)
    ref_r = xor_loss_ref(out_r, tgt_r, w_r, weight_decay)
    assert jnp.allclose(loss_r, ref_r, rtol=1e-4, atol=1e-4), (loss_r, ref_r)

    print("KERNEL_OK")
</pallas_src>

<mosaic_0001>
module attributes {stable_mosaic.version = 11 : i64} {
  func.func @_xor_loss_kernel(%arg0: i32, %arg1: i32, %arg2: memref<1x1xf32, #tpu.memory_space<smem>>, %arg3: memref<128x128xf32, #tpu.memory_space<vmem>>, %arg4: memref<128x128xf32, #tpu.memory_space<vmem>>, %arg5: memref<16x256xf32, #tpu.memory_space<vmem>>, %arg6: memref<1x1x1xf32, #tpu.memory_space<vmem>>, %arg7: memref<128x128xf32, #tpu.memory_space<vmem>>) attributes {dimension_semantics = [#tpu.dimension_semantics<parallel>, #tpu.dimension_semantics<arbitrary>], iteration_bounds = array<i64: 2, 1>, scalar_prefetch = 0 : i64, scratch_operands = 1 : i64, tpu.core_type = #tpu.core_type<tc>, window_params = [{transform_indices = @transform_0, window_bounds = array<i64: 1, 1>}, {transform_indices = @transform_1, window_bounds = array<i64: 128, 128>}, {transform_indices = @transform_2, window_bounds = array<i64: 128, 128>}, {pipeline_mode = #tpu.pipeline_mode<synchronous>, transform_indices = @transform_3, window_bounds = array<i64: 16, 256>}, {transform_indices = @transform_4, window_bounds = array<i64: 1, 1, 1>}]} {
    %c0_i32 = arith.constant 0 : i32
    %0 = arith.cmpi eq, %arg1, %c0_i32 : i32
    %1 = arith.extui %0 : i1 to i32
    %c0_i32_0 = arith.constant 0 : i32
    %2 = arith.cmpi ne, %1, %c0_i32_0 : i32
    scf.if %2 {
      %cst_11 = arith.constant 0.000000e+00 : f32
      %23 = vector.broadcast %cst_11 : f32 to vector<128x128xf32>
      %c0_12 = arith.constant 0 : index
      %c0_13 = arith.constant 0 : index
      %24 = vector.load %arg7[%c0_12, %c0_13] : memref<128x128xf32, #tpu.memory_space<vmem>>, vector<128x128xf32>
      tpu.vector_store %arg7[%c0_12, %c0_13], %23 {strides = array<i32>} : memref<128x128xf32, #tpu.memory_space<vmem>>, vector<128x128xf32>,
    } else {
    }
    %c0 = arith.constant 0 : index
    %c0_1 = arith.constant 0 : index
    %3 = vector.load %arg3[%c0, %c0_1] : memref<128x128xf32, #tpu.memory_space<vmem>>, vector<128x128xf32>
    %c0_2 = arith.constant 0 : index
    %c0_3 = arith.constant 0 : index
    %4 = vector.load %arg4[%c0_2, %c0_3] : memref<128x128xf32, #tpu.memory_space<vmem>>, vector<128x128xf32>
    %5 = arith.subf %3, %4 : vector<128x128xf32>
    %6 = arith.mulf %5, %5 : vector<128x128xf32>
    %c1_i32 = arith.constant 1 : i32
    %7 = arith.muli %arg0, %c1_i32 : i32
    %8 = arith.addi %7, %arg1 : i32
    %c128_i32 = arith.constant 128 : i32
    %9 = arith.muli %8, %c128_i32 : i32
    %10 = tpu.iota {dimensions = array<i32: 0>} : vector<128x128xi32>
    %11 = vector.broadcast %9 : i32 to vector<128x128xi32>
    %12 = arith.addi %11, %10 : vector<128x128xi32>
    %c128_i32_4 = arith.constant 128 : i32
    %13 = vector.broadcast %c128_i32_4 : i32 to vector<128x128xi32>
    %14 = arith.cmpi slt, %12, %13 : vector<128x128xi32>
    %cst = arith.constant 0.000000e+00 : f32
    %15 = vector.broadcast %cst : f32 to vector<128x128xf32>
    %16 = arith.select %14, %6, %15 : vector<128x128xi1>, vector<128x128xf32>
    %c0_5 = arith.constant 0 : index
    %c0_6 = arith.constant 0 : index
    %17 = vector.load %arg7[%c0_5, %c0_6] : memref<128x128xf32, #tpu.memory_space<vmem>>, vector<128x128xf32>
    %18 = arith.addf %17, %16 : vector<128x128xf32>
    %c0_7 = arith.constant 0 : index
    %c0_8 = arith.constant 0 : index
    %19 = vector.load %arg7[%c0_7, %c0_8] : memref<128x128xf32, #tpu.memory_space<vmem>>, vector<128x128xf32>
    tpu.vector_store %arg7[%c0_7, %c0_8], %18 {strides = array<i32>} : memref<128x128xf32, #tpu.memory_space<vmem>>, vector<128x128xf32>,
    %c0_i32_9 = arith.constant 0 : i32
    %20 = arith.cmpi eq, %arg1, %c0_i32_9 : i32
    %21 = arith.extui %20 : i1 to i32
    %c0_i32_10 = arith.constant 0 : i32
    %22 = arith.cmpi ne, %21, %c0_i32_10 : i32
    scf.if %22 {
      %c0_11 = arith.constant 0 : index
      %c0_12 = arith.constant 0 : index
      %23 = vector.load %arg7[%c0_11, %c0_12] : memref<128x128xf32, #tpu.memory_space<vmem>>, vector<128x128xf32>
      %24 = vector.shape_cast %23 : vector<128x128xf32> to vector<1x128x128xf32>
      %cst_13 = arith.constant dense<0.000000e+00> : vector<1xf32>
      %25 = vector.multi_reduction <add>, %24, %cst_13 [1, 2] : vector<1x128x128xf32> to vector<1xf32>
      %26 = vector.shape_cast %25 : vector<1xf32> to vector<1x1x1xf32>
      %27 = vector.extract %26[0, 0, 0] : f32 from vector<1x1x1xf32>
      %28 = vector.broadcast %27 : f32 to vector<1x1xf32>
      %cst_14 = arith.constant 1.562500e-02 : f32
      %29 = vector.broadcast %cst_14 : f32 to vector<1x1xf32>
      %30 = arith.mulf %28, %29 : vector<1x1xf32>
      %c0_15 = arith.constant 0 : index
      %c0_16 = arith.constant 0 : index
      %31 = vector.load %arg5[%c0_15, %c0_16] : memref<16x256xf32, #tpu.memory_space<vmem>>, vector<16x256xf32>
      %cst_17 = arith.constant 3.906250e-03 : f32
      %32 = vector.broadcast %cst_17 : f32 to vector<16x256xf32>
      %33 = arith.subf %31, %32 : vector<16x256xf32>
      %34 = arith.mulf %33, %33 : vector<16x256xf32>
      %35 = vector.shape_cast %34 : vector<16x256xf32> to vector<1x16x256xf32>
      %cst_18 = arith.constant dense<0.000000e+00> : vector<1xf32>
      %36 = vector.multi_reduction <add>, %35, %cst_18 [1, 2] : vector<1x16x256xf32> to vector<1xf32>
      %37 = vector.shape_cast %36 : vector<1xf32> to vector<1x1x1xf32>
      %38 = vector.extract %37[0, 0, 0] : f32 from vector<1x1x1xf32>
      %39 = vector.broadcast %38 : f32 to vector<1x1xf32>
      %c0_19 = arith.constant 0 : index
      %c0_20 = arith.constant 0 : index
      %40 = memref.load %arg2[%c0_19, %c0_20] : memref<1x1xf32, #tpu.memory_space<smem>>
      %41 = vector.broadcast %40 : f32 to vector<1x1xf32>
      %42 = arith.mulf %39, %41 : vector<1x1xf32>
      %c0_i32_21 = arith.constant 0 : i32
      %43 = arith.cmpi eq, %arg0, %c0_i32_21 : i32
      %cst_22 = arith.constant 0.000000e+00 : f32
      %44 = vector.broadcast %cst_22 : f32 to vector<1x1xf32>
      %45 = arith.select %43, %42, %44 : vector<1x1xf32>
      %46 = arith.addf %30, %45 : vector<1x1xf32>
      %47 = vector.shape_cast %46 : vector<1x1xf32> to vector<1x1x1xf32>
      %c0_23 = arith.constant 0 : index
      %c0_24 = arith.constant 0 : index
      %c0_25 = arith.constant 0 : index
      %48 = vector.load %arg6[%c0_23, %c0_24, %c0_25] : memref<1x1x1xf32, #tpu.memory_space<vmem>>, vector<1x1x1xf32>
      tpu.vector_store %arg6[%c0_23, %c0_24, %c0_25], %47 {strides = array<i32>} : memref<1x1x1xf32, #tpu.memory_space<vmem>>, vector<1x1x1xf32>,
    } else {
    }
    return
  }
  func.func @transform_0(%arg0: i32, %arg1: i32) -> (i32, i32) {
    %c0_i32 = arith.constant 0 : i32
    %c0_i32_0 = arith.constant 0 : i32
    %c0_i32_1 = arith.constant 0 : i32
    return %c0_i32, %c0_i32_0 : i32, i32
  }
  func.func @transform_1(%arg0: i32, %arg1: i32) -> (i32, i32) {
    %c1_i32 = arith.constant 1 : i32
    %0 = arith.muli %arg0, %c1_i32 : i32
    %1 = arith.addi %0, %arg1 : i32
    %c0_i32 = arith.constant 0 : i32
    %2 = arith.minsi %1, %c0_i32 : i32
    %c0_i32_0 = arith.constant 0 : i32
    %c0_i32_1 = arith.constant 0 : i32
    return %2, %c0_i32_0 : i32, i32
  }
  func.func @transform_2(%arg0: i32, %arg1: i32) -> (i32, i32) {
    %c1_i32 = arith.constant 1 : i32
    %0 = arith.muli %arg0, %c1_i32 : i32
    %1 = arith.addi %0, %arg1 : i32
    %c0_i32 = arith.constant 0 : i32
    %2 = arith.minsi %1, %c0_i32 : i32
    %c0_i32_0 = arith.constant 0 : i32
    %c0_i32_1 = arith.constant 0 : i32
    return %2, %c0_i32_0 : i32, i32
  }
  func.func @transform_3(%arg0: i32, %arg1: i32) -> (i32, i32) {
    %c0_i32 = arith.constant 0 : i32
    %c0_i32_0 = arith.constant 0 : i32
    %c0_i32_1 = arith.constant 0 : i32
    return %c0_i32, %c0_i32_0 : i32, i32
  }
  func.func @transform_4(%arg0: i32, %arg1: i32) -> (i32, i32, i32) {
    %c0_i32 = arith.constant 0 : i32
    %c0_i32_0 = arith.constant 0 : i32
    %c0_i32_1 = arith.constant 0 : i32
    return %arg0, %c0_i32, %c0_i32_0 : i32, i32, i32
  }
}

</mosaic_0001>

<bundles_post_ra>
// kernel: tpu_custom_call.1
= control target key start
LH: loop header
LB: loop body
LE: loop exit
PB: predicated region body
PF: predicated region fallthrough
CT: control target
= control target key end

     0   :  { %s1173_s0 = inlined_call_operand.<no memory space> [shape: f32[1,1], index: 0, kind: input, shape index: {}]   ;;  %s1174_s1 = inlined_call_operand.hbm [shape: f32[128,128], index: 1, kind: input, shape index: {}]   ;;  %s1175_s2 = inlined_call_operand.hbm [shape: f32[128,128], index: 2, kind: input, shape index: {}]   ;;  %s1176_s3 = inlined_call_operand.hbm [shape: f32[16,256], index: 3, kind: input, shape index: {}]   ;;  %s1177_s4 = inlined_call_operand.vmem [shape: f32[2,1,1], index: 4, kind: output, shape index: {}]  }
   0x1   :  { %9 = sst [smem:[#allocation3]] %s1173_s0 }
   0x2   :  { %10 = vsyncpa [#allocation5], 0 }
   0x3   :  { %12 = vsyncpa [#allocation5 + $0x1], 0 }
   0x4   :  { %13 = vsyncpa [#allocation7], 0 }
   0x5   :  { %15 = vsyncpa [#allocation7 + $0x1], 0  ;;  %s978_s17 = smov 0   ;;  %s980_s18 = smov 0  }
   0x6   :  { %s982_s19 = smov 0   ;;  %s984_s20 = smov 0  }
   0x7   :  { %s986_s21 = smov 0  }
   0x8 LB: > { %s693_s0 = sadd.s32 4294967295, %s941_s21   ;;  %p80_p0 = scmp.ne.s32.totalorder %s929_s18, %s925_s17  ;;  %s941_s21 = sphi %s986_s21, %s21_s21   ;;  %s937_s20 = sphi %s984_s20, %s1184_s20   ;;  %s933_s19 = sphi %s982_s19, %s1183_s19   ;;  %s929_s18 = sphi %s980_s18, %s1163_s18   ;;  %s925_s17 = sphi %s978_s17, %s1182_s17  }
   0x9   : > { %p1005_p1 = scmp.eq.s32.totalorder %s693_s0, 0  ;;  %p695_p2 = scmp.ge.s32.totalorder %s941_s21, 1 }
   0xa   : > { %p170_p3 = scmp.lt.s32.totalorder %s941_s21, 3  ;;  %s184_s26 = sshll.u32 %s1176_s3, 4  ;;  %s185_s26 = int_to_ptr.hbm [resolvable:$true] %s184_s26 }
   0xb   : > { %p1013_p4 = por %p1005_p1, %p80_p0  ;;  %s943_s28 = smov [#allocation8]  }
   0xc   : > { %p1020_p5 = pnand %p695_p2, %p170_p3  ;;  %s186_s29 = sshll.u32 %s943_s28, 4  ;;  %s187_s29 = int_to_ptr.vmem [resolvable:$true] %s186_s29 }
   0xd   : > { %s944_s30 = smov 256   ;;  %s945_s5 = smov 16  }
   0xe   : > { %p729_p6 = pneg %p1020_p5  ;;  %s33_s6 = sadd.s32 1, %s937_s20 }
   0xf   : > { %p35_p8 = scmp.ge.s32.totalorder %s33_s6, 2  ;;  %p922_p9 = scmp.ne.s32.totalorder %s929_s18, 0 }
  0x10   : > { %p730_p7 = pnand %p729_p6, %p1005_p1  ;;  %p75_p10 = scmp.eq.s32.totalorder %s941_s21, 0 }
  0x11   : > { %s1186_s6 = smov (%p35_p8, %s33_s6), 0  ;;  %p741_p11 = scmp.lt.s32.totalorder %s941_s21, 2 }
  0x12   : > { %732 = dma.hbm_to_vmem [thread:$0]  (!%p730_p7), %s185_s26, 512, %s187_s29, [#allocation7], %s944_s30, %s944_s30, %s945_s5  }
  0x13   : > { %p76_p12 = por %p922_p9, %p75_p10  ;;  %s946_s7 = smov [#allocation4]  }
  0x14   : > { %s215_s8 = sshll.u32 %s946_s7, 4  ;;  %s213_s11 = sshll.u32 %s1174_s1, 4  ;;  %s216_s8 = int_to_ptr.vmem [resolvable:$true] %s215_s8  ;;  %s214_s11 = int_to_ptr.hbm [resolvable:$true] %s213_s11 }
  0x15   : > { %p1037_p13 = pnand %p741_p11, %p76_p12  ;;  %s826_s13 = sshra.s32 %s214_s11, 4  ;;  %s827_s13 = int_to_ptr.hbm [resolvable:$true] %s826_s13 }
  0x16   : > { %s828_s14 = scalar_lea.hbm %s827_s13, 128  ;;  %s833_s17 = scalar_lea.hbm %s1174_s1, 128 }
  0x17   : > { %p829_p0 = scmp.ne.s32.totalorder %s827_s13, %s828_s14  ;;  %p830_p2 = pneg %p1037_p13 }
  0x18   : > { %p835_p7 = scmp.lt.s32.totalorder %s833_s17, %s828_s14 }
  0x19   : > { %p831_p3 = pnand %p830_p2, %p829_p0 }
  0x1b   : > { %p832_p6 = pneg %p831_p3 }
  0x1d   : > { %p837_p8 = pnand %p835_p7, %p832_p6 }
  0x1f   : > { %840 = shalt.err (!%p837_p8)
}
  0x20   : > { %s947_s24 = smov 128   ;;  %s948_s25 = smov 8  }
  0x21   : > { %736 = dma.hbm_to_vmem [thread:$0]  (!%p1037_p13), %s214_s11, 2048, %s216_s8, [#allocation5], %s947_s24, %s947_s24, %s948_s25  }
  0x22   : > { %s238_s29 = sshll.u32 %s1175_s2, 4  ;;  %s949_s30 = smov [#allocation6]   ;;  %s239_s29 = int_to_ptr.hbm [resolvable:$true] %s238_s29 }
  0x23   : > { %s240_s5 = sshll.u32 %s949_s30, 4  ;;  %s225_s7 = sand.u32 1, %s941_s21   ;;  %s241_s5 = int_to_ptr.vmem [resolvable:$true] %s240_s5 }
  0x24   : > { %s226_s9 = scalar_lea.sflag [#allocation7], %s225_s7  ;;  %s856_s10 = sshra.s32 %s239_s29, 4  ;;  %s857_s10 = int_to_ptr.hbm [resolvable:$true] %s856_s10 }
  0x25   : > { %s858_s13 = scalar_lea.hbm %s857_s10, 128  ;;  %s863_s11 = scalar_lea.hbm %s1175_s2, 128 }
  0x26   : > { %p859_p9 = scmp.ne.s32.totalorder %s857_s10, %s858_s13  ;;  %p865_p12 = scmp.lt.s32.totalorder %s863_s11, %s858_s13 }
  0x28   : > { %p861_p10 = pnand %p859_p9, %p830_p2 }
  0x2a   : > { %p862_p11 = pneg %p861_p10 }
  0x2c   : > { %p867_p0 = pnand %p865_p12, %p862_p11 }
  0x2e   : > { %870 = shalt.err (!%p867_p0)
}
  0x2f   : > { %739 = dma.hbm_to_vmem [thread:$0]  (!%p1037_p13), %s239_s29, 2048, %s241_s5, %s226_s9, %s947_s24, %s947_s24, %s948_s25  }
  0x30   : > { %252 = sbr.rel (%p1020_p5) target bundleno = 294 (0x126), region = 36  ;;  %s254_s15 = sand.u32 (!%p1020_p5), 1, %s929_s18  }
  0x31   : > { %s705_s16 = sshll.u32 (!%p1020_p5), %s254_s15, 7  ;;  %s255_s17 = scalar_lea.sflag (!%p1020_p5), [#allocation5], %s254_s15 }
  0x32   : > { %s1066_s26 = scalar_lea.vmem (!%p1020_p5), [#allocation4], %s705_s16 }
  0x35   : > { %911 = dma.done.wait (%p1013_p4), %s255_s17, 2048  }
  0x36   : > { %913 = vsyncadd (%p1013_p4), %s255_s17, 4294965248  ;;  %s264_s12 = sand.u32 1, %s693_s0   ;;  %s1074_s25 = scalar_lea.vmem [#allocation6], %s705_s16 }
  0x37   : > { %s265_s24 = scalar_lea.sflag [#allocation7], %s264_s12 }
  0x38   : > { %915 = dma.done.wait (%p1013_p4), %s265_s24, 2048  }
  0x39   : > { %917 = vsyncadd (%p1013_p4), %s265_s24, 4294965248 }
  0x3a   : > { %919 = dma.done.wait (%p1005_p1), [#allocation7], 512  }
  0x3b   : > { %921 = vsyncadd (%p1005_p1), [#allocation7], 4294966784  ;;  %v399_v0 = vlaneseq  ;;  %s708_s0 = sshll.u32 %s933_s19, 7  ;;  %v333_v2 = vld [vmem:[%s1066_s26] sm:$0xff]  ;;  %v334_v3 = vld [vmem:[%s1066_s26 + $0x8] sm:$0xff]  ;;  %p586_p1 = scmp.eq.s32.totalorder %s933_s19, 0 }
  0x3c   : > { %v349_v4 = vld [vmem:[%s1074_s25] sm:$0xff]  ;;  %v350_v5 = vld [vmem:[%s1074_s25 + $0x8] sm:$0xff]  ;;  %v1092_v7 = vstv %s708_s0  ;;  %v335_v8 = vld [vmem:[%s1066_s26 + $0x10] sm:$0xff]  ;;  %s583_s22 = sld [smem:[#allocation3]]  ;;  %p310_p4 = scmp.lt.s32.totalorder %s933_s19, 1 }
  0x3d   : > { %v1084_v1 = vshrl.u32 %v399_v0, 7  ;;  %v351_v9 = vld [vmem:[%s1074_s25 + $0x10] sm:$0xff]  ;;  %v365_v11 = vsub.f32 %v333_v2, %v349_v4  ;;  %v366_v12 = vsub.f32 %v334_v3, %v350_v5  ;;  %v336_v13 = vld [vmem:[%s1066_s26 + $0x18] sm:$0xff]  ;;  %v337_v19 = vld [vmem:[%s1066_s26 + $0x20] sm:$0xff]  ;;  %s587_s23 = scalar_select %p586_p1, 1, 0 }
  0x3e   : > { %v352_v14 = vld [vmem:[%s1074_s25 + $0x18] sm:$0xff]  ;;  %v367_v18 = vsub.f32 %v335_v8, %v351_v9  ;;  %v353_v20 = vld [vmem:[%s1074_s25 + $0x20] sm:$0xff]  ;;  %v338_v26 = vld [vmem:[%s1066_s26 + $0x28] sm:$0xff]  ;;  %s1188_s19 = smov (!%p310_p4, %s933_s19), 1 }
  0x3f   : > { %v401_v6 = vadd.s32 8, %v1084_v1  ;;  %v402_v10 = vadd.s32 16, %v1084_v1  ;;  %v403_v15 = vadd.s32 24, %v1084_v1  ;;  %v417_v16 = vadd.s32 %v1092_v7, %v1084_v1  ;;  %v354_v27 = vld [vmem:[%s1074_s25 + $0x28] sm:$0xff]  ;;  %v339_v32 = vld [vmem:[%s1066_s26 + $0x30] sm:$0xff]  ;;  %v340_v40 = vld [vmem:[%s1066_s26 + $0x38] sm:$0xff]  ;;  %s312_s5 = scalar_lea.vmem %s1177_s4, %s1188_s19 }
  0x40   : > { %v404_v21 = vadd.s32 32, %v1084_v1  ;;  %v368_v23 = vsub.f32 %v336_v13, %v352_v14  ;;  %v381_v24 = vmul.f32 %v365_v11, %v365_v11  ;;  %v382_v25 = vmul.f32 %v366_v12, %v366_v12  ;;  %v355_v33 = vld [vmem:[%s1074_s25 + $0x30] sm:$0xff]  ;;  %v356_v41 = vld [vmem:[%s1074_s25 + $0x38] sm:$0xff]  ;;  %v341_v47 = vld [vmem:[%s1066_s26 + $0x40] sm:$0xff] }
  0x41   : > { %v418_v17 = vadd.s32 %v1092_v7, %v401_v6  ;;  %v419_v22 = vadd.s32 %v1092_v7, %v402_v10  ;;  %v405_v28 = vadd.s32 40, %v1084_v1  ;;  %v420_v29 = vadd.s32 %v1092_v7, %v403_v15  ;;  %v357_v48 = vld [vmem:[%s1074_s25 + $0x40] sm:$0xff]  ;;  %v342_v55 = vld [vmem:[%s1066_s26 + $0x48] sm:$0xff]  ;;  %v343_v63 = vld [vmem:[%s1066_s26 + $0x50] sm:$0xff] }
  0x42   : > { %vm433_vm0 = vcmp.lt.s32.totalorder %v417_v16, 128  ;;  %v369_v30 = vsub.f32 %v337_v19, %v353_v20  ;;  %v383_v31 = vmul.f32 %v367_v18, %v367_v18  ;;  %v406_v34 = vadd.s32 48, %v1084_v1  ;;  %v358_v56 = vld [vmem:[%s1074_s25 + $0x48] sm:$0xff]  ;;  %v359_v0 = vld [vmem:[%s1074_s25 + $0x50] sm:$0xff]  ;;  %v344_v9 = vld [vmem:[%s1066_s26 + $0x58] sm:$0xff] }
  0x43   : > { %vm434_vm1 = vcmp.lt.s32.totalorder %v418_v17, 128  ;;  %v421_v35 = vadd.s32 %v1092_v7, %v404_v21  ;;  %vm435_vm2 = vcmp.lt.s32.totalorder %v419_v22, 128  ;;  %v370_v36 = vsub.f32 %v338_v26, %v354_v27  ;;  %v360_v10 = vld [vmem:[%s1074_s25 + $0x58] sm:$0xff]  ;;  %v345_v17 = vld [vmem:[%s1066_s26 + $0x60] sm:$0xff]  ;;  %v362_v26 = vld [vmem:[%s1074_s25 + $0x68] sm:$0xff] }
  0x44   : > { %v384_v37 = vmul.f32 %v368_v23, %v368_v23  ;;  %v449_v38 = vsel %vm433_vm0, %v381_v24, 0.0  ;;  %v450_v39 = vsel %vm434_vm1, %v382_v25, 0.0  ;;  %v407_v42 = vadd.s32 56, %v1084_v1  ;;  %v361_v18 = vld [vmem:[%s1074_s25 + $0x60] sm:$0xff]  ;;  %v346_v25 = vld [vmem:[%s1066_s26 + $0x68] sm:$0xff] }
  0x45   : > { %v422_v43 = vadd.s32 %v1092_v7, %v405_v28  ;;  %vm436_vm3 = vcmp.lt.s32.totalorder %v420_v29, 128  ;;  %v371_v44 = vsub.f32 %v339_v32, %v355_v33  ;;  %v385_v45 = vmul.f32 %v369_v30, %v369_v30  ;;  %v347_v33 = vld [vmem:[%s1066_s26 + $0x70] sm:$0xff] }
  0x46   : > { %v451_v46 = vsel %vm435_vm2, %v383_v31, 0.0  ;;  %v408_v49 = vadd.s32 64, %v1084_v1  ;;  %v423_v50 = vadd.s32 %v1092_v7, %v406_v34  ;;  %vm437_vm4 = vcmp.lt.s32.totalorder %v421_v35, 128  ;;  %v363_v34 = vld [vmem:[%s1074_s25 + $0x70] sm:$0xff] }
  0x47   : > { %v532_v51 = vadd.f32 %v450_v39, %v449_v38  ;;  %v372_v52 = vsub.f32 %v340_v40, %v356_v41  ;;  %v386_v53 = vmul.f32 %v370_v36, %v370_v36  ;;  %v452_v54 = vsel %vm436_vm3, %v384_v37, 0.0 }
  0x48   : > { %v409_v57 = vadd.s32 72, %v1084_v1  ;;  %v424_v58 = vadd.s32 %v1092_v7, %v407_v42  ;;  %vm438_vm5 = vcmp.lt.s32.totalorder %v422_v43, 128  ;;  %v373_v60 = vsub.f32 %v341_v47, %v357_v48  ;;  %v348_v42 = vld [vmem:[%s1066_s26 + $0x78] sm:$0xff] }
  0x49   : > { %v533_v59 = vadd.f32 %v532_v51, %v451_v46  ;;  %v387_v61 = vmul.f32 %v371_v44, %v371_v44  ;;  %v453_v62 = vsel %vm437_vm4, %v385_v45, 0.0  ;;  %v410_v2 = vadd.s32 80, %v1084_v1  ;;  %v364_v43 = vld [vmem:[%s1074_s25 + $0x78] sm:$0xff] }
  0x4a   : > { %v425_v3 = vadd.s32 %v1092_v7, %v408_v49  ;;  %vm439_vm6 = vcmp.lt.s32.totalorder %v423_v50, 128  ;;  %v374_v5 = vsub.f32 %v342_v55, %v358_v56  ;;  %v388_v6 = vmul.f32 %v372_v52, %v372_v52  ;;  %v558_v49 = vld [vmem:[#allocation8] sm:$0xff]  ;;  %v559_v50 = vld [vmem:[#allocation8 + $0x8] sm:$0xff] }
  0x4b   : > { %v534_v4 = vadd.f32 %v533_v59, %v452_v54  ;;  %v454_v8 = vsel %vm438_vm5, %v386_v53, 0.0  ;;  %v411_v11 = vadd.s32 88, %v1084_v1  ;;  %v426_v12 = vadd.s32 %v1092_v7, %v409_v57 }
  0x4c   : > { %vm440_vm7 = vcmp.lt.s32.totalorder %v424_v58, 128  ;;  %v375_v14 = vsub.f32 %v343_v63, %v359_v0  ;;  %v389_v15 = vmul.f32 %v373_v60, %v373_v60  ;;  %v455_v16 = vsel %vm439_vm6, %v387_v61, 0.0  ;;  %v560_v61 = vld [vmem:[#allocation8 + $0x10] sm:$0xff] }
  0x4d   : > { %v535_v13 = vadd.f32 %v534_v4, %v453_v62  ;;  %v412_v19 = vadd.s32 96, %v1084_v1  ;;  %v427_v20 = vadd.s32 %v1092_v7, %v410_v2  ;;  %vm441_vm8 = vcmp.lt.s32.totalorder %v425_v3, 128 }
  0x4e   : > { %v376_v22 = vsub.f32 %v344_v9, %v360_v10  ;;  %v390_v23 = vmul.f32 %v374_v5, %v374_v5  ;;  %v456_v24 = vsel %vm440_vm7, %v388_v6, 0.0  ;;  %v413_v27 = vadd.s32 104, %v1084_v1 }
  0x4f   : > { %v536_v21 = vadd.f32 %v535_v13, %v454_v8  ;;  %v428_v28 = vadd.s32 %v1092_v7, %v411_v11  ;;  %vm442_vm9 = vcmp.lt.s32.totalorder %v426_v12, 128  ;;  %v377_v30 = vsub.f32 %v345_v17, %v361_v18  ;;  %v561_v8 = vld [vmem:[#allocation8 + $0x18] sm:$0xff] }
  0x50   : > { %v391_v31 = vmul.f32 %v375_v14, %v375_v14  ;;  %v457_v32 = vsel %vm441_vm8, %v389_v15, 0.0  ;;  %v414_v35 = vadd.s32 112, %v1084_v1  ;;  %v429_v36 = vadd.s32 %v1092_v7, %v412_v19 }
  0x51   : > { %v537_v29 = vadd.f32 %v536_v21, %v455_v16  ;;  %vm443_vm10 = vcmp.lt.s32.totalorder %v427_v20, 128  ;;  %v378_v38 = vsub.f32 %v346_v25, %v362_v26  ;;  %v392_v39 = vmul.f32 %v376_v22, %v376_v22 }
  0x52   : > { %v415_v40 = vadd.s32 120, %v1084_v1  ;;  %v458_v41 = vsel %vm442_vm9, %v390_v23, 0.0  ;;  %v430_v44 = vadd.s32 %v1092_v7, %v413_v27  ;;  %vm444_vm11 = vcmp.lt.s32.totalorder %v428_v28, 128 }
  0x53   : > { %v538_v37 = vadd.f32 %v537_v29, %v456_v24  ;;  %v379_v46 = vsub.f32 %v347_v33, %v363_v34  ;;  %v393_v47 = vmul.f32 %v377_v30, %v377_v30  ;;  %v459_v48 = vsel %vm443_vm10, %v391_v31, 0.0 }
  0x54   : > { %v431_v51 = vadd.s32 %v1092_v7, %v414_v35  ;;  %vm445_vm12 = vcmp.lt.s32.totalorder %v429_v36, 128  ;;  %v380_v53 = vsub.f32 %v348_v42, %v364_v43  ;;  %v394_v54 = vmul.f32 %v378_v38, %v378_v38 }
  0x55   : > { %v539_v45 = vadd.f32 %v538_v37, %v457_v32  ;;  %v432_v1 = vadd.s32 %v1092_v7, %v415_v40  ;;  %v460_v55 = vsel %vm444_vm11, %v392_v39, 0.0  ;;  %vm446_vm13 = vcmp.lt.s32.totalorder %v430_v44, 128 }
  0x56   : > { %v709_v57 = vadd.f32 -0.00390625, %v558_v49  ;;  %v710_v58 = vadd.f32 -0.00390625, %v559_v50  ;;  %v395_v59 = vmul.f32 %v379_v46, %v379_v46  ;;  %v461_v60 = vsel %vm445_vm12, %v393_v47, 0.0 }
  0x57   : > { %v540_v52 = vadd.f32 %v539_v45, %v458_v41  ;;  %vm447_vm14 = vcmp.lt.s32.totalorder %v431_v51, 128  ;;  %v396_v63 = vmul.f32 %v380_v53, %v380_v53  ;;  %vm448_vm15 = vcmp.lt.s32.totalorder %v432_v1, 128 }
  0x58   : > { %v462_v0 = vsel %vm446_vm13, %v394_v54, 0.0  ;;  %v711_v3 = vadd.f32 -0.00390625, %v560_v61  ;;  %v566_v4 = vmul.f32 %v709_v57, %v709_v57  ;;  %v567_v5 = vmul.f32 %v710_v58, %v710_v58 }
  0x59   : > { %v541_v56 = vadd.f32 %v540_v52, %v459_v48  ;;  %v463_v6 = vsel %vm447_vm14, %v395_v59, 0.0  ;;  %v464_v9 = vsel %vm448_vm15, %v396_v63, 0.0  ;;  %v712_v11 = vadd.f32 -0.00390625, %v561_v8 }
  0x5a   : > { %v568_v12 = vmul.f32 %v711_v3, %v711_v3  ;;  %v570_v13 = vadd.f32 %v567_v5, %v566_v4  ;;  %v588_v32 = vstv %s587_s23  ;;  %v584_v33 = vstv %s583_s22 }
  0x5b   : > { %v542_v62 = vadd.f32 %v541_v56, %v460_v55  ;;  %v569_v15 = vmul.f32 %v712_v11, %v712_v11  ;;  %vm589_vm0 = vcmp.eq.s32.totalorder %v588_v32, 1  ;;  %vm592_vm1 = vcmask 0  }
  0x5c   : > { %v571_v16 = vadd.f32 %v570_v13, %v568_v12 }
  0x5d   : > { %v543_v2 = vadd.f32 %v542_v62, %v461_v60 }
  0x5e   : > { %v572_v17 = vadd.f32 %v571_v16, %v569_v15 }
  0x5f   : > { %v544_v7 = vadd.f32 %v543_v2, %v462_v0 }
  0x61   : > { %v545_v10 = vadd.f32 %v544_v7, %v463_v6 }
  0x63   : > { %v546_v14 = vadd.f32 %v545_v10, %v464_v9 }
  0x65   : > { %547 = vadd.xlane.f32.xlu0 %v546_v14 }
  0x6d   : > { %573 = vadd.xlane.f32.xlu0 %v572_v17 }
  0xd8   : > { %v548_v18 = vpop.xlane.xlu0 %547 }
  0xd9   : > { %v549_v19 = vrot.slane %v548_v18, 4 }
  0xdb   : > { %v550_v20 = vadd.f32 %v549_v19, %v548_v18 }
  0xdd   : > { %v551_v21 = vrot.slane %v550_v20, 2 }
  0xdf   : > { %v552_v22 = vadd.f32 %v551_v21, %v550_v20 }
  0xe0   : > { %v574_v23 = vpop.xlane.xlu0 %573 }
  0xe1   : > { %v575_v24 = vrot.slane %v574_v23, 4  ;;  %v553_v25 = vrot.slane %v552_v22, 1 }
  0xe3   : > { %v576_v26 = vadd.f32 %v575_v24, %v574_v23  ;;  %v554_v27 = vadd.f32 %v553_v25, %v552_v22 }
  0xe5   : > { %v577_v28 = vrot.slane %v576_v26, 2  ;;  %717 = vpush %v554_v27 }
  0xe7   : > { %v578_v29 = vadd.f32 %v577_v28, %v576_v26 }
  0xe9   : > { %v579_v30 = vrot.slane %v578_v29, 1 }
  0xeb   : > { %v580_v31 = vadd.f32 %v579_v30, %v578_v29 }
  0xed   : > { %719 = vpush %v580_v31 }
 0x116   : > { %s718_s27 = spop %717 }
 0x117   : > { %v556_v34 = vstv %s718_s27 }
 0x118   : > { %v557_v37 = vmul.f32 0.015625, %v556_v34 }
 0x11e   : > { %s720_s28 = spop %719 }
 0x11f   : > { %v582_v35 = vstv %s720_s28 }
 0x120   : > { %v585_v36 = vmul.f32 %v584_v33, %v582_v35 }
 0x122   : > { %v590_v38 = vsel %vm589_vm0, %v585_v36, 0.0 }
 0x123   : > { %v591_v39 = vadd.f32 %v590_v38, %v557_v37 }
 0x125   : > { %593 = vst.msk [vmem:[%s312_s5] sm:$0x1] %vm592_vm1, %v591_v39 }
 0x126 PF: > { %s21_s21 = sadd.s32 1, %s941_s21   ;;  %s1182_s17 = smov %s929_s18 }
 0x127   : > { %p18_p5 = scmp.ge.s32.totalorder %s21_s21, 4   ;;  %s1163_s18 = smov 0  }
 0x128   : > { %s1183_s19 = smov %s937_s20  ;;  %s1184_s20 = smov %s1186_s6 }
 0x129   :  { %20 = sbr.rel (!%p18_p5) target bundleno = 8 (0x8), region = 101 }
 0x12e   :  { %611 = vsyncpa [#allocation5], 1 }
 0x12f   :  { %613 = vsyncpa [#allocation5 + $0x1], 1 }
 0x130   :  { %614 = vsyncpa [#allocation7], 1 }
 0x131   :  { %616 = vsyncpa [#allocation7 + $0x1], 1 }

</bundles_post_ra>
